<compile_context>
chip_gen: v7x
topology: tpu7x:2x2x1
jax: 0.10.0
libtpu: 0.0.40
codegen_flags: <defaults>
</compile_context>

<pallas_src>
import math

import jax
import jax.numpy as jnp
from jax.experimental import pallas as pl
from jax.experimental.pallas import tpu as pltpu


def modely_kernel(f_ref, gamma_ref, z_ref, w1_ref, b1_ref, w2_ref, b2_ref,
                  w3_ref, out_ref):
    """One batch tile: fused gamma gather + 2 bf16 MXU matmuls + f32 epilogues."""
    # Fused provider-effect gather: lin[r] = gamma[F[r]] via one-hot select.
    f = f_ref[...]                                                     # (TB, 1) i32
    prov = jax.lax.broadcasted_iota(jnp.int32, gamma_ref.shape, 1)     # (1, NPp)
    lin = jnp.sum(jnp.where(f == prov, gamma_ref[...], 0.0),
                  axis=-1, keepdims=True)                              # (TB, 1) f32

    z = z_ref[...]                                                     # (TB, Zd) bf16
    h1 = jnp.dot(z, w1_ref[...], preferred_element_type=jnp.float32)   # (TB, H1) f32 acc
    h1 = jnp.maximum(h1 + b1_ref[...], 0.0)                            # bias + ReLU in f32
    h2 = jnp.dot(h1.astype(jnp.bfloat16), w2_ref[...],
                 preferred_element_type=jnp.float32)                   # (TB, H2) f32 acc
    h2 = jnp.maximum(h2 + b2_ref[...], 0.0)
    # Linear(128, 1, bias=False): VPU multiply + lane reduce instead of N=1 MXU matmul.
    nonlin = jnp.sum(h2 * w3_ref[...], axis=-1, keepdims=True)         # (TB, 1) f32
    out_ref[...] = jax.nn.sigmoid(lin + nonlin)


def _choose_tile(B, tile_b):
    """Balanced batch tile: >=2 tiles when feasible (v7x), minimal padding."""
    n_tiles = pl.cdiv(B, tile_b)
    # v7x has 2 TensorCores; the "parallel" batch axis shards across them only
    # if there are >= 2 tiles.  Split once B is big enough for >=256 rows/tile.
    if n_tiles < 2 and B >= 512:
        n_tiles = 2
    raw = pl.cdiv(B, n_tiles)
    tb16 = 16 * pl.cdiv(raw, 16)          # bf16 sublane packing granularity
    tb256 = 256 * pl.cdiv(raw, 256)       # v6e/v7x MXU M-pass granularity
    # Snap to 256 only when the extra padded rows are a negligible fraction of B.
    TB = tb256 if (tb256 - raw) * n_tiles <= max(B // 64, 1) else tb16
    n_tiles = pl.cdiv(B, TB)
    return TB, n_tiles


def modely_forward(F_ids, Z, params, *, tile_b=1024):
    """F_ids: (B,) int (or float) provider ids; Z: (B, Z_dim) f32. Returns (B,) f32."""
    gamma, W1, b1, W2, b2, W3 = (
        params["gamma"], params["W1"], params["b1"],
        params["W2"], params["b2"], params["W3"],
    )
    B, Z_dim = Z.shape
    H1 = W1.shape[1]
    H2 = W2.shape[1]
    NP = gamma.shape[0]
    NPp = 128 * pl.cdiv(NP, 128)          # lane-pad gamma; valid ids < NP never hit pad

    TB, n_tiles = _choose_tile(B, tile_b)
    Bp = n_tiles * TB

    # Mirrors the torch forward's F.int() handling for float-typed provider ids.
    f_col = F_ids.astype(jnp.int32).reshape(B, 1)
    if Bp != B:
        Z = jnp.pad(Z, ((0, Bp - B), (0, 0)))
        f_col = jnp.pad(f_col, ((0, Bp - B), (0, 0)))   # pad rows -> provider 0, sliced off

    # bf16 MXU operands (accumulation stays f32 in-kernel); biases/W3/gamma stay f32.
    z_bf = Z.astype(jnp.bfloat16)
    w1_bf = W1.astype(jnp.bfloat16)
    w2_bf = W2.astype(jnp.bfloat16)
    b1_f = b1.reshape(1, H1).astype(jnp.float32)
    b2_f = b2.reshape(1, H2).astype(jnp.float32)
    w3_row = W3.reshape(1, H2).astype(jnp.float32)
    gamma_row = jnp.pad(gamma.astype(jnp.float32), (0, NPp - NP)).reshape(1, NPp)

    weight_bytes = (Z_dim * H1 + H1 * H2) * 2 + (H1 + H2 + H2 + NPp) * 4
    cost = pl.CostEstimate(
        flops=2 * Bp * (Z_dim * H1 + H1 * H2 + H2) + Bp * NPp,
        transcendentals=Bp,                                 # one sigmoid (exp) per row
        bytes_accessed=Bp * (Z_dim * 2 + 4 + 4) + weight_bytes,
    )

    out = pl.pallas_call(
        modely_kernel,
        out_shape=jax.ShapeDtypeStruct((Bp, 1), jnp.float32),
        grid=(n_tiles,),
        in_specs=[
            pl.BlockSpec((TB, 1), lambda i: (i, 0)),        # F ids (follow batch tile)
            pl.BlockSpec((1, NPp), lambda i: (0, 0)),       # gamma (VMEM-resident)
            pl.BlockSpec((TB, Z_dim), lambda i: (i, 0)),    # Z     (follow batch tile)
            pl.BlockSpec((Z_dim, H1), lambda i: (0, 0)),    # W1    (VMEM-resident)
            pl.BlockSpec((1, H1), lambda i: (0, 0)),        # b1
            pl.BlockSpec((H1, H2), lambda i: (0, 0)),       # W2
            pl.BlockSpec((1, H2), lambda i: (0, 0)),        # b2
            pl.BlockSpec((1, H2), lambda i: (0, 0)),        # W3 as a (1, H2) row
        ],
        out_specs=pl.BlockSpec((TB, 1), lambda i: (i, 0)),
        compiler_params=pltpu.CompilerParams(
            dimension_semantics=("parallel",),              # independent batch tiles
        ),
        cost_estimate=cost,
    )(f_col, gamma_row, z_bf, w1_bf, b1_f, w2_bf, b2_f, w3_row)

    return out[:B, 0]                                       # squeeze(-1) -> (B,)


def xavier_uniform(key, fan_in, fan_out, dtype=jnp.float32):
    # Matches torch.nn.init.xavier_uniform_ bound; stored as (in, out).
    bound = math.sqrt(6.0 / (fan_in + fan_out))
    return jax.random.uniform(key, (fan_in, fan_out), dtype=dtype,
                              minval=-bound, maxval=bound)


def init_params(key, n_providers, Z_dim):
    k1, k2, k3 = jax.random.split(key, 3)
    return {
        "gamma": jnp.zeros((n_providers,), jnp.float32),    # nn.Parameter(zeros)
        "W1": xavier_uniform(k1, Z_dim, 256),
        "b1": jnp.zeros((1, 256), jnp.float32),             # zeros bias
        "W2": xavier_uniform(k2, 256, 128),
        "b2": jnp.zeros((1, 128), jnp.float32),             # zeros bias
        "W3": xavier_uniform(k3, 128, 1),                   # Linear(128, 1, bias=False)
    }


def _reference(F_ids, Z, params):
    h1 = jnp.maximum(Z @ params["W1"] + params["b1"], 0.0)
    h2 = jnp.maximum(h1 @ params["W2"] + params["b2"], 0.0)
    return jax.nn.sigmoid(params["gamma"][F_ids] + (h2 @ params["W3"])[:, 0])


if __name__ == "__main__":
    key = jax.random.PRNGKey(0)
    k_params, k_f, k_z, k_f2, k_z2, k_f3, k_z3 = jax.random.split(key, 7)

    n_providers = 5
    Z_dim = 16

    params = init_params(k_params, n_providers, Z_dim)
    # Make gamma non-trivial so the fused gather is actually exercised.
    params["gamma"] = 0.3 * jax.random.normal(k_params, (n_providers,), jnp.float32)

    # Small batch: single-block path (B=8 -> TB=16, grid=(1,)).
    batch = 8
    F_ids = jax.random.randint(k_f, (batch,), 0, n_providers, dtype=jnp.int32)
    Z = jax.random.normal(k_z, (batch, Z_dim), dtype=jnp.float32)
    y = modely_forward(F_ids, Z, params)
    jax.block_until_ready(y)
    ref = _reference(F_ids, Z, params)
    assert y.shape == (batch,)
    # bf16 MXU operands (f32 accumulate) -> loose tolerance vs. the f32 reference.
    assert jnp.allclose(y, ref, atol=1e-2, rtol=1e-2)

    # Mid batch with default tile: exercises forced 2-tile split (B=600 -> TB=304, grid=(2,)).
    batch2 = 600
    F_ids2 = jax.random.randint(k_f2, (batch2,), 0, n_providers, dtype=jnp.int32)
    Z2 = jax.random.normal(k_z2, (batch2, Z_dim), dtype=jnp.float32)
    y2 = modely_forward(F_ids2, Z2, params)
    jax.block_until_ready(y2)
    ref2 = _reference(F_ids2, Z2, params)
    assert y2.shape == (batch2,)
    assert jnp.allclose(y2, ref2, atol=1e-2, rtol=1e-2)

    # Explicit small tile: balanced 3-tile grid with minimal padding (TB=208, grid=(3,)).
    batch3 = 600
    F_ids3 = jax.random.randint(k_f3, (batch3,), 0, n_providers, dtype=jnp.int32)
    Z3 = jax.random.normal(k_z3, (batch3, Z_dim), dtype=jnp.float32)
    y3 = modely_forward(F_ids3, Z3, params, tile_b=256)
    jax.block_until_ready(y3)
    ref3 = _reference(F_ids3, Z3, params)
    assert y3.shape == (batch3,)
    assert jnp.allclose(y3, ref3, atol=1e-2, rtol=1e-2)

    print("KERNEL_OK")
</pallas_src>

<mosaic_0001>
module attributes {stable_mosaic.version = 11 : i64} {
  func.func @modely_kernel(%arg0: i32, %arg1: memref<16x1xi32, #tpu.memory_space<vmem>>, %arg2: memref<1x128xf32, #tpu.memory_space<vmem>>, %arg3: memref<16x16xbf16, #tpu.memory_space<vmem>>, %arg4: memref<16x256xbf16, #tpu.memory_space<vmem>>, %arg5: memref<1x256xf32, #tpu.memory_space<vmem>>, %arg6: memref<256x128xbf16, #tpu.memory_space<vmem>>, %arg7: memref<1x128xf32, #tpu.memory_space<vmem>>, %arg8: memref<1x128xf32, #tpu.memory_space<vmem>>, %arg9: memref<16x1xf32, #tpu.memory_space<vmem>>) attributes {dimension_semantics = [#tpu.dimension_semantics<parallel>], iteration_bounds = array<i64: 1>, scalar_prefetch = 0 : i64, scratch_operands = 0 : i64, tpu.core_type = #tpu.core_type<tc>, window_params = [{transform_indices = @transform_0, window_bounds = array<i64: 16, 1>}, {pipeline_mode = #tpu.pipeline_mode<synchronous>, transform_indices = @transform_1, window_bounds = array<i64: 1, 128>}, {transform_indices = @transform_2, window_bounds = array<i64: 16, 16>}, {pipeline_mode = #tpu.pipeline_mode<synchronous>, transform_indices = @transform_3, window_bounds = array<i64: 16, 256>}, {pipeline_mode = #tpu.pipeline_mode<synchronous>, transform_indices = @transform_4, window_bounds = array<i64: 1, 256>}, {pipeline_mode = #tpu.pipeline_mode<synchronous>, transform_indices = @transform_5, window_bounds = array<i64: 256, 128>}, {pipeline_mode = #tpu.pipeline_mode<synchronous>, transform_indices = @transform_6, window_bounds = array<i64: 1, 128>}, {pipeline_mode = #tpu.pipeline_mode<synchronous>, transform_indices = @transform_7, window_bounds = array<i64: 1, 128>}, {transform_indices = @transform_8, window_bounds = array<i64: 16, 1>}]} {
    %c0 = arith.constant 0 : index
    %c0_0 = arith.constant 0 : index
    %0 = vector.load %arg1[%c0, %c0_0] : memref<16x1xi32, #tpu.memory_space<vmem>>, vector<16x1xi32>
    %1 = tpu.iota {dimensions = array<i32: 1>} : vector<1x128xi32>
    %2 = vector.broadcast %0 : vector<16x1xi32> to vector<16x128xi32>
    %3 = vector.broadcast %1 : vector<1x128xi32> to vector<16x128xi32>
    %4 = arith.cmpi eq, %2, %3 : vector<16x128xi32>
    %c0_1 = arith.constant 0 : index
    %c0_2 = arith.constant 0 : index
    %5 = vector.load %arg2[%c0_1, %c0_2] : memref<1x128xf32, #tpu.memory_space<vmem>>, vector<1x128xf32>
    %cst = arith.constant 0.000000e+00 : f32
    %6 = vector.shape_cast %5 : vector<1x128xf32> to vector<1x128xf32>
    %7 = vector.broadcast %6 : vector<1x128xf32> to vector<16x128xf32>
    %8 = vector.broadcast %cst : f32 to vector<16x128xf32>
    %9 = arith.select %4, %7, %8 : vector<16x128xi1>, vector<16x128xf32>
    %cst_3 = arith.constant dense<0.000000e+00> : vector<16xf32>
    %10 = vector.multi_reduction <add>, %9, %cst_3 [1] : vector<16x128xf32> to vector<16xf32>
    %11 = vector.shape_cast %10 : vector<16xf32> to vector<16x1xf32>
    %c0_4 = arith.constant 0 : index
    %c0_5 = arith.constant 0 : index
    %12 = vector.load %arg3[%c0_4, %c0_5] : memref<16x16xbf16, #tpu.memory_space<vmem>>, vector<16x16xbf16>
    %c0_6 = arith.constant 0 : index
    %c0_7 = arith.constant 0 : index
    %13 = vector.load %arg4[%c0_6, %c0_7] : memref<16x256xbf16, #tpu.memory_space<vmem>>, vector<16x256xbf16>
    %cst_8 = arith.constant dense<0.000000e+00> : vector<16x256xf32>
    %14 = tpu.matmul %12, %13, %cst_8 {dimension_numbers = #tpu.dot_dimension_numbers<[1], [0], [0], [1], [0, 0, 1, 1], [], []>} : vector<16x16xbf16>, vector<16x256xbf16>, vector<16x256xf32> -> vector<16x256xf32>
    %c0_9 = arith.constant 0 : index
    %c0_10 = arith.constant 0 : index
    %15 = vector.load %arg5[%c0_9, %c0_10] : memref<1x256xf32, #tpu.memory_space<vmem>>, vector<1x256xf32>
    %16 = vector.broadcast %15 : vector<1x256xf32> to vector<16x256xf32>
    %17 = arith.addf %14, %16 : vector<16x256xf32>
    %cst_11 = arith.constant 0.000000e+00 : f32
    %18 = vector.broadcast %cst_11 : f32 to vector<16x256xf32>
    %19 = arith.maximumf %17, %18 : vector<16x256xf32>
    %20 = arith.truncf %19 : vector<16x256xf32> to vector<16x256xbf16>
    %c0_12 = arith.constant 0 : index
    %c0_13 = arith.constant 0 : index
    %21 = vector.load %arg6[%c0_12, %c0_13] : memref<256x128xbf16, #tpu.memory_space<vmem>>, vector<256x128xbf16>
    %cst_14 = arith.constant dense<0.000000e+00> : vector<16x128xf32>
    %22 = tpu.matmul %20, %21, %cst_14 {dimension_numbers = #tpu.dot_dimension_numbers<[1], [0], [0], [1], [0, 0, 1, 1], [], []>} : vector<16x256xbf16>, vector<256x128xbf16>, vector<16x128xf32> -> vector<16x128xf32>
    %c0_15 = arith.constant 0 : index
    %c0_16 = arith.constant 0 : index
    %23 = vector.load %arg7[%c0_15, %c0_16] : memref<1x128xf32, #tpu.memory_space<vmem>>, vector<1x128xf32>
    %24 = vector.broadcast %23 : vector<1x128xf32> to vector<16x128xf32>
    %25 = arith.addf %22, %24 : vector<16x128xf32>
    %cst_17 = arith.constant 0.000000e+00 : f32
    %26 = vector.broadcast %cst_17 : f32 to vector<16x128xf32>
    %27 = arith.maximumf %25, %26 : vector<16x128xf32>
    %c0_18 = arith.constant 0 : index
    %c0_19 = arith.constant 0 : index
    %28 = vector.load %arg8[%c0_18, %c0_19] : memref<1x128xf32, #tpu.memory_space<vmem>>, vector<1x128xf32>
    %29 = vector.broadcast %28 : vector<1x128xf32> to vector<16x128xf32>
    %30 = arith.mulf %27, %29 : vector<16x128xf32>
    %cst_20 = arith.constant dense<0.000000e+00> : vector<16xf32>
    %31 = vector.multi_reduction <add>, %30, %cst_20 [1] : vector<16x128xf32> to vector<16xf32>
    %32 = vector.shape_cast %31 : vector<16xf32> to vector<16x1xf32>
    %33 = arith.addf %11, %32 : vector<16x1xf32>
    %34 = arith.negf %33 : vector<16x1xf32>
    %35 = math.exp %34 : vector<16x1xf32>
    %cst_21 = arith.constant 1.000000e+00 : f32
    %36 = vector.broadcast %cst_21 : f32 to vector<16x1xf32>
    %37 = arith.addf %36, %35 : vector<16x1xf32>
    %38 = arith.divf %36, %37 : vector<16x1xf32>
    %c0_22 = arith.constant 0 : index
    %c0_23 = arith.constant 0 : index
    %39 = vector.load %arg9[%c0_22, %c0_23] : memref<16x1xf32, #tpu.memory_space<vmem>>, vector<16x1xf32>
    tpu.vector_store %arg9[%c0_22, %c0_23], %38 {strides = array<i32>} : memref<16x1xf32, #tpu.memory_space<vmem>>, vector<16x1xf32>,
    return
  }
  func.func @transform_0(%arg0: i32) -> (i32, i32) {
    %c0_i32 = arith.constant 0 : i32
    %c0_i32_0 = arith.constant 0 : i32
    return %arg0, %c0_i32 : i32, i32
  }
  func.func @transform_1(%arg0: i32) -> (i32, i32) {
    %c0_i32 = arith.constant 0 : i32
    %c0_i32_0 = arith.constant 0 : i32
    %c0_i32_1 = arith.constant 0 : i32
    return %c0_i32, %c0_i32_0 : i32, i32
  }
  func.func @transform_2(%arg0: i32) -> (i32, i32) {
    %c0_i32 = arith.constant 0 : i32
    %c0_i32_0 = arith.constant 0 : i32
    return %arg0, %c0_i32 : i32, i32
  }
  func.func @transform_3(%arg0: i32) -> (i32, i32) {
    %c0_i32 = arith.constant 0 : i32
    %c0_i32_0 = arith.constant 0 : i32
    %c0_i32_1 = arith.constant 0 : i32
    return %c0_i32, %c0_i32_0 : i32, i32
  }
  func.func @transform_4(%arg0: i32) -> (i32, i32) {
    %c0_i32 = arith.constant 0 : i32
    %c0_i32_0 = arith.constant 0 : i32
    %c0_i32_1 = arith.constant 0 : i32
    return %c0_i32, %c0_i32_0 : i32, i32
  }
  func.func @transform_5(%arg0: i32) -> (i32, i32) {
    %c0_i32 = arith.constant 0 : i32
    %c0_i32_0 = arith.constant 0 : i32
    %c0_i32_1 = arith.constant 0 : i32
    return %c0_i32, %c0_i32_0 : i32, i32
  }
  func.func @transform_6(%arg0: i32) -> (i32, i32) {
    %c0_i32 = arith.constant 0 : i32
    %c0_i32_0 = arith.constant 0 : i32
    %c0_i32_1 = arith.constant 0 : i32
    return %c0_i32, %c0_i32_0 : i32, i32
  }
  func.func @transform_7(%arg0: i32) -> (i32, i32) {
    %c0_i32 = arith.constant 0 : i32
    %c0_i32_0 = arith.constant 0 : i32
    %c0_i32_1 = arith.constant 0 : i32
    return %c0_i32, %c0_i32_0 : i32, i32
  }
  func.func @transform_8(%arg0: i32) -> (i32, i32) {
    %c0_i32 = arith.constant 0 : i32
    %c0_i32_0 = arith.constant 0 : i32
    return %arg0, %c0_i32 : i32, i32
  }
}

</mosaic_0001>

<bundles_post_ra>
// kernel: tpu_custom_call.1
= control target key start
LH: loop header
LB: loop body
LE: loop exit
PB: predicated region body
PF: predicated region fallthrough
CT: control target
= control target key end

     0   :  { %13 = vsyncpa [#allocation3], 0  ;;  %s470_s27 = smov [#allocation2]   ;;  %s564_s0 = inlined_call_operand.vmem [shape: s32[16,1], index: 0, kind: input, shape index: {}]   ;;  %s565_s1 = inlined_call_operand.vmem [shape: f32[1,128], index: 1, kind: input, shape index: {}]   ;;  %s566_s2 = inlined_call_operand.vmem [shape: bf16[16,16], index: 2, kind: input, shape index: {}]   ;;  %s567_s3 = inlined_call_operand.vmem [shape: bf16[16,256], index: 3, kind: input, shape index: {}]   ;;  %s568_s4 = inlined_call_operand.vmem [shape: f32[1,256], index: 4, kind: input, shape index: {}]   ;;  %s569_s5 = inlined_call_operand.hbm [shape: bf16[256,128], index: 5, kind: input, shape index: {}]   ;;  %s570_s6 = inlined_call_operand.vmem [shape: f32[1,128], index: 6, kind: input, shape index: {}]   ;;  %s571_s7 = inlined_call_operand.vmem [shape: f32[1,128], index: 7, kind: input, shape index: {}]   ;;  %s572_s8 = inlined_call_operand.vmem [shape: f32[16,1], index: 8, kind: output, shape index: {}]  }
   0x1   :  { %s29_s28 = sshll.u32 %s470_s27, 4  ;;  %s446_s9 = scalar_lea.hbm %s569_s5, 2048  ;;  %s30_s28 = int_to_ptr.vmem [resolvable:$true] %s29_s28 }
   0x2   :  { %p447_p0 = scmp.ne.s32.totalorder %s569_s5, %s446_s9  ;;  %p450_p1 = scmp.lt.u32.totalorder %s446_s9, %s569_s5 }
   0x4   :  { %p452_p2 = pnand %p450_p1, %p447_p0 }
   0x6   :  { %455 = shalt.err (!%p452_p2)
}
   0x7   :  { %s456_s14 = scalar_lea.vmem %s30_s28, 2048  ;;  %p461_p4 = scmp.lt.s32.totalorder %s30_s28, %s30_s28 }
   0x8   :  { %p457_p3 = scmp.ne.s32.totalorder %s30_s28, %s456_s14  ;;  %p462_p5 = scmp.lt.s32.totalorder %s456_s14, %s456_s14 }
   0xa   :  { %p463_p6 = por %p462_p5, %p461_p4 }
   0xc   :  { %p464_p7 = pnand %p463_p6, %p457_p3 }
   0xe   :  { %467 = shalt.err (!%p464_p7)
}
   0xf   :  { %s471_s15 = smov 64   ;;  %s472_s16 = smov 4  }
  0x10   :  { %35 = dma.hbm_to_vmem [thread:$0]  %s569_s5, 2048, %s30_s28, [#allocation3], %s471_s15, %s471_s15, %s472_s16  }
  0x11   :  { %468 = dma.done.wait [#allocation3], 2048  }
  0x12   :  { %469 = vsyncadd [#allocation3], 4294965248  ;;  %v473_v0 = vmov 0   ;;  %v418_v1 = vld [vmem:[%s567_s3 + $0x4] ss:$8 sps:$4 sm:$0xff]   ;;  %vm100_vm0 = vcmask 130048   ;;  %v46_v22 = vlaneseq }
  0x13   :  { %136 = vmatprep.mubr.bf16.mxu0 %v473_v0  ;;  %417 = vset.pattern.permute.xlu0 %v473_v0  ;;  %v420_v2 = vld [vmem:[%s567_s3] ss:$8 sps:$4 sm:$0xff]   ;;  %v422_v4 = vld [vmem:[#allocation2 + $0x40] sm:$0xff]   ;;  %v428_v10 = vld [vmem:[#allocation2 + $0x58] sm:$0xff]   ;;  %vm358_vm3 = vcmask 7168  }
  0x14   :  { %104 = vmatprep.subr.bf16.mxu0 %v418_v1  ;;  %v421_v3 = vld [vmem:[%s566_s2] sm:$0xff]   ;;  %v423_v5 = vld [vmem:[#allocation2] sm:$0xff]   ;;  %391 = vmatprep.subr.bf16.mxu1 %v422_v4  ;;  %v426_v8 = vld [vmem:[#allocation2 + $0x50] sm:$0xff]   ;;  %v76_v23 = vshrl.u32 %v46_v22, 7  ;;  %v47_v43 = vand.u32 127, %v46_v22 }
  0x15   :  { %105 = vmatpush1.bf16.msra.mxu0 %v420_v2  ;;  %v424_v6 = vld [vmem:[#allocation2 + $0x48] sm:$0xff]   ;;  %392 = vmatpush3.bf16.msra.mxu1 %v423_v5  ;;  %v427_v9 = vld [vmem:[#allocation2 + $0x10] sm:$0xff]   ;;  %v429_v11 = vld [vmem:[#allocation2 + $0x18] sm:$0xff]  }
  0x16   :  { %v425_v7 = vld [vmem:[#allocation2 + $0x8] sm:$0xff]   ;;  %393 = vmatprep.subr.bf16.mxu1 %v424_v6  ;;  %v430_v12 = vld [vmem:[#allocation2 + $0x60] sm:$0xff]   ;;  %v434_v16 = vld [vmem:[#allocation2 + $0x70] sm:$0xff]   ;;  %v77_v24 = vsub.s32 0, %v76_v23  ;;  %v81_v26 = vsub.s32 1, %v76_v23 }
  0x17   :  { %v431_v13 = vld [vmem:[#allocation2 + $0x20] sm:$0xff]   ;;  %v432_v14 = vld [vmem:[#allocation2 + $0x68] sm:$0xff]   ;;  %v435_v17 = vld [vmem:[#allocation2 + $0x30] sm:$0xff]  }
  0x18   :  { %370 = vmatmul.mubr.msk.bf16.vlgmr.msra.gmra.mrb[0].mxu0 %vm100_vm0, %v421_v3  ;;  %v433_v15 = vld [vmem:[#allocation2 + $0x28] sm:$0xff]   ;;  %v436_v18 = vld [vmem:[#allocation2 + $0x78] sm:$0xff]   ;;  %v45_v21 = vld [vmem:[%s564_s0 + $0x8] sm:$0xff] }
  0x19   :  { %394 = vmatpush3.bf16.msra.mxu1 %v425_v7  ;;  %v437_v19 = vld [vmem:[#allocation2 + $0x38] sm:$0xff]   ;;  %v44_v20 = vld [vmem:[%s564_s0] sm:$0xff] }
  0x1a   :  { %395 = vmatprep.subr.bf16.mxu1 %v426_v8  ;;  %49 = vperm.xlu0 %417, %v44_v20   ;;  %v73_v25 = vld [vmem:[%s568_s4] sm:$0x3] }
  0x1b   :  { %v78_v27 = vrot.slane %v73_v25, %v77_v24  ;;  %v82_v28 = vrot.slane %v73_v25, %v81_v26  ;;  %v366_v45 = vld [vmem:[%s565_s1] ss:$0 sm:$0xff] }
  0x1c   :  { %v371_v50 = vld [vmem:[%s570_s6] ss:$0 sm:$0xff] }
  0x1d   :  { %396 = vmatpush3.bf16.msra.mxu1 %v427_v9  ;;  %v388_v57 = vld [vmem:[%s571_s7] ss:$0 sm:$0xff] }
  0x1e   :  { %397 = vmatprep.subr.bf16.mxu1 %v428_v10  ;;  %52 = vperm.xlu0 %417, %v45_v21  }
  0x21   :  { %398 = vmatpush3.bf16.msra.mxu1 %v429_v11 }
  0x22   :  { %399 = vmatprep.subr.bf16.mxu1 %v430_v12 }
  0x25   :  { %400 = vmatpush3.bf16.msra.mxu1 %v431_v13 }
  0x26   :  { %401 = vmatprep.subr.bf16.mxu1 %v432_v14 }
  0x29   :  { %402 = vmatpush3.bf16.msra.mxu1 %v433_v15 }
  0x2a   :  { %403 = vmatprep.subr.bf16.mxu1 %v434_v16 }
  0x2d   :  { %404 = vmatpush3.bf16.msra.mxu1 %v435_v17 }
  0x2e   :  { %405 = vmatprep.subr.bf16.mxu1 %v436_v18 }
  0x31   :  { %406 = vmatpush3.bf16.msra.mxu1 %v437_v19 }
  0x99   :  { %v50_v44 = vpop.permute.xlu0 %49 }
  0x9a   :  { %vm54_vm1 = vcmp.eq.s32.totalorder %v50_v44, %v47_v43 }
  0x9b   :  { %v63_v46 = vsel %vm54_vm1, %v366_v45, 0.0 }
  0x9c   :  { %65 = vadd.xlane.f32.xlu1 %v63_v46 }
  0x9d   :  { %v53_v47 = vpop.permute.xlu0 %52 }
  0x9e   :  { %vm55_vm2 = vcmp.eq.s32.totalorder %v53_v47, %v47_v43 }
  0x9f   :  { %v64_v48 = vsel %vm55_vm2, %v366_v45, 0.0 }
  0xa0   :  { %67 = vadd.xlane.f32.xlu1 %v64_v48 }
  0xeb   :  { %v138_v29 = vpop.f32.mrb[0].mxu0 }
  0xec   :  { %v139_v30 = vadd.f32 %v138_v29, %v78_v27  ;;  %v140_v31 = vpop.f32.mrb[1].mxu0 }
  0xed   :  { %v141_v32 = vadd.f32 %v140_v31, %v82_v28  ;;  %v142_v33 = vpop.f32.mrb[2].mxu0 }
  0xee   :  { %v143_v34 = vadd.f32 %v142_v33, %v78_v27  ;;  %v144_v35 = vpop.f32.mrb[3].mxu0  ;;  %v147_v37 = vmax.f32 %v139_v30, 0.0 }
  0xef   :  { %v145_v36 = vadd.f32 %v144_v35, %v82_v28  ;;  %v148_v39 = vmax.f32 %v141_v32, 0.0 }
  0xf0   :  { %v149_v38 = vmax.f32 %v143_v34, 0.0 }
  0xf1   :  { %v150_v40 = vmax.f32 %v145_v36, 0.0 }
  0xf2   :  { %v151_v41 = vpack.c.bf16 %v149_v38, %v147_v37 }
  0xf3   :  { %v152_v42 = vpack.c.bf16 %v150_v40, %v148_v39 }
  0xf5   :  { %320 = vmatprep.mubr.bf16.mxu1 %v152_v42 }
  0xf6   :  { %321 = vmatmul.mubr.bf16.vlgmr.msra.gmra.mrb[0].mxu1 %v151_v41 }
 0x129   :  { %v66_v63 = vpop.xlane.xlu1 %65 }
 0x12d   :  { %v68_v0 = vpop.xlane.xlu1 %67 }
 0x1c9   :  { %v407_v49 = vpop.f32.mrb[0].mxu1 }
 0x1ca   :  { %v408_v51 = vpop.f32.mrb[1].mxu1 }
 0x1cb   :  { %v409_v52 = vadd.f32 %v408_v51, %v407_v49  ;;  %v410_v53 = vpop.f32.mrb[2].mxu1 }
 0x1cc   :  { %v411_v54 = vpop.f32.mrb[3].mxu1 }
 0x1cd   :  { %v323_v55 = vadd.f32 %v409_v52, %v371_v50  ;;  %v412_v56 = vadd.f32 %v411_v54, %v410_v53 }
 0x1cf   :  { %v329_v58 = vmax.f32 %v323_v55, 0.0  ;;  %v326_v59 = vadd.f32 %v412_v56, %v371_v50 }
 0x1d1   :  { %v330_v60 = vmax.f32 %v326_v59, 0.0  ;;  %v338_v61 = vmul.f32 %v388_v57, %v329_v58 }
 0x1d3   :  { %340 = vadd.xlane.f32.xlu0 %v338_v61  ;;  %v339_v62 = vmul.f32 %v388_v57, %v330_v60 }
 0x1d5   :  { %342 = vadd.xlane.f32.xlu1 %v339_v62 }
 0x260   :  { %v341_v1 = vpop.xlane.xlu0 %340 }
 0x261   :  { %v344_v2 = vadd.f32 %v341_v1, %v66_v63 }
 0x262   :  { %v343_v3 = vpop.xlane.xlu1 %342 }
 0x263   :  { %v389_v4 = vmul.f32 -1.442695, %v344_v2  ;;  %v345_v5 = vadd.f32 %v343_v3, %v68_v0 }
 0x265   :  { %438 = vpow2.f32 %v389_v4  ;;  %v390_v6 = vmul.f32 -1.442695, %v345_v5 }
 0x267   :  { %440 = vpow2.f32 %v390_v6 }
 0x26f   :  { %v439_v7 = vpop.eup %438 }
 0x270   :  { %v352_v8 = vadd.f32 1.0, %v439_v7 }
 0x271   :  { %v441_v9 = vpop.eup %440 }
 0x272   :  { %442 = vrcp.f32 %v352_v8  ;;  %v353_v10 = vadd.f32 1.0, %v441_v9 }
 0x274   :  { %444 = vrcp.f32 %v353_v10 }
 0x27c   :  { %v443_v11 = vpop.eup %442 }
 0x27d   :  { %359 = vst.msk [vmem:[%s572_s8] sm:$0xff] %vm358_vm3, %v443_v11 }
 0x27e   :  { %v445_v12 = vpop.eup %444 }
 0x27f   :  { %360 = vst.msk [vmem:[%s572_s8 + $0x8] sm:$0xff] %vm358_vm3, %v445_v12 }
 0x280   :  { %365 = vsyncpa [#allocation3], 1 }

</bundles_post_ra>
